<compile_context>
chip_gen: v5e
topology: v5e:2x2
jax: 0.10.0
libtpu: 0.0.40
codegen_flags: <defaults>
</compile_context>

<pallas_src>
import functools

import jax
import jax.numpy as jnp
from jax import lax
from jax.experimental import pallas as pl
from jax.experimental.pallas import tpu as pltpu


def _round_up(x, m):
    return ((x + m - 1) // m) * m


def _vmem_capacity_bytes():
    try:
        return int(pltpu.get_tpu_info().vmem_capacity_bytes)
    except Exception:
        return 64 * 1024 * 1024  # conservative fallback (v7x per-TC VMEM)


def _pick_tile_n(n, c, itemsize, n_streamed, budget_bytes, cap=2048):
    """Row-tile size.  `n_streamed` big (tile_n, C) inputs x 2 pipeline buffers
    x tile_n x C x itemsize must stay within `budget_bytes`."""
    bytes_per_row = 2 * n_streamed * c * itemsize
    t = int(budget_bytes // max(bytes_per_row, 1))
    t = min(t, cap, _round_up(n, 8))
    if t >= 128:
        # Lane-dense output blocks.
        t = (t // 128) * 128
        # Keep >= 2 grid steps for moderate batches so the "parallel" grid axis
        # can use both v7x TensorCores instead of serializing on one.
        if t >= n and n >= 256:
            t = max(_round_up(pl.cdiv(n, 2), 128), 128)
    else:
        # Vocab-scale C: a 128-row tile would blow the budget.  Use a sublane
        # multiple; output store becomes a cheap masked vst (output bytes are
        # ~1/C of input bytes, irrelevant here).
        # TODO(synk): for very large C, add a class-dim grid axis with an
        # online logsumexp (running max/sum + running sum(x*y)) so tile_n can
        # stay large within the VMEM budget.
        t = max((t // 8) * 8, 8)
    return t


def _store_row_losses(out_ref, row_loss, n_rows, tile_n):
    """Mask rows past the (ragged) batch end and store per-row losses.

    out_ref is (1, tile_n) (lane-dense, preferred) or (tile_n, 1) (sublane
    fallback for very large C)."""
    start = pl.program_id(0) * tile_n
    if out_ref.shape[0] == 1:
        ids = lax.broadcasted_iota(jnp.int32, (1, tile_n), 1) + start
        vals = row_loss[None, :]
    else:
        ids = lax.broadcasted_iota(jnp.int32, (tile_n, 1), 0) + start
        vals = row_loss[:, None]
    out_ref[...] = jnp.where(ids < n_rows, vals, 0.0)


def _ce_dense_kernel(x_ref, y_ref, out_ref, *, n_rows, tile_n):
    """Soft/one-hot targets: x, y are (tile_n, C)."""
    x = x_ref[...].astype(jnp.float32)
    y = y_ref[...].astype(jnp.float32)

    # Numerically stable logsumexp over the class (lane) dim.
    # Note: a fully -inf row yields NaN, matching PyTorch log_softmax.
    m = jnp.max(x, axis=-1)
    lse = jnp.log(jnp.sum(jnp.exp(x - m[:, None]), axis=-1)) + m

    # -sum(log_softmax(x)*y, -1) == lse * sum(y, -1) - sum(x*y, -1)
    # TODO(synk): optional per-class `weight` would enter here as
    #   lse * sum(y*w, -1) - sum(x*y*w, -1) plus a weighted 'mean' denominator.
    sum_y = jnp.sum(y, axis=-1)
    sum_xy = jnp.sum(x * y, axis=-1)
    row_loss = lse * sum_y - sum_xy
    _store_row_losses(out_ref, row_loss, n_rows, tile_n)


def _ce_label_kernel(x_ref, lbl_ref, out_ref, *, n_rows, tile_n):
    """Hard integer labels: x is (tile_n, C), lbl is (tile_n, 1) int32."""
    x = x_ref[...].astype(jnp.float32)
    lbl = lbl_ref[...].astype(jnp.int32)

    m = jnp.max(x, axis=-1)
    lse = jnp.log(jnp.sum(jnp.exp(x - m[:, None]), axis=-1)) + m

    cls = lax.broadcasted_iota(jnp.int32, x.shape, 1)          # (tile_n, C)
    x_at_lbl = jnp.sum(jnp.where(cls == lbl, x, 0.0), axis=-1)  # x[row, label]
    row_loss = lse - x_at_lbl                                    # sum_y == 1
    _store_row_losses(out_ref, row_loss, n_rows, tile_n)


def cross_entropy_loss(x, y, reduction="mean", tile_n=None):
    """Cross entropy between logits x and targets y (see module docstring).

    bf16 x / y are welcome (kernel upcasts to f32); they halve HBM traffic on
    this bandwidth-bound kernel.
    """
    if x.ndim == 1:
        # PyTorch class_dim = 0 degenerate case: a single row of logits.
        c = x.shape[0]
        row = cross_entropy_loss(x[None, :], jnp.asarray(y)[None, ...],
                                 reduction="none", tile_n=tile_n)
        loss = row[0]
        if reduction == "mean":
            return loss / c          # reference divides by X.shape[0] (= C here)
        return loss                  # 'sum' and 'none' both reduce to a scalar

    assert x.ndim == 2, "expects (N, C) logits with the class dim last"
    n, c = x.shape
    label_path = (y.ndim == 1) and jnp.issubdtype(y.dtype, jnp.integer)

    phys_vmem = _vmem_capacity_bytes()
    input_budget = int(phys_vmem * 0.6)   # double-buffered streamed inputs
    vmem_limit = int(phys_vmem * 0.9)     # leave headroom for output + scratch

    itemsize = jnp.dtype(x.dtype).itemsize
    n_streamed = 1 if label_path else 2
    if tile_n is None:
        tile_n = _pick_tile_n(n, c, itemsize, n_streamed, input_budget)

    grid = (pl.cdiv(n, tile_n),)
    n_pad = grid[0] * tile_n
    lane_dense = (tile_n % 128) == 0

    if lane_dense:
        out_shape = jax.ShapeDtypeStruct((1, n_pad), jnp.float32)
        out_spec = pl.BlockSpec((1, tile_n), lambda i: (0, i))
    else:
        out_shape = jax.ShapeDtypeStruct((n_pad, 1), jnp.float32)
        out_spec = pl.BlockSpec((tile_n, 1), lambda i: (i, 0))

    x_spec = pl.BlockSpec((tile_n, c), lambda i: (i, 0))
    if label_path:
        kernel = functools.partial(_ce_label_kernel, n_rows=n, tile_n=tile_n)
        y_in = y.reshape(n, 1).astype(jnp.int32)
        y_spec = pl.BlockSpec((tile_n, 1), lambda i: (i, 0))
        y_bytes = n * 4
    else:
        assert y.shape == (n, c), "dense targets must match logits shape"
        kernel = functools.partial(_ce_dense_kernel, n_rows=n, tile_n=tile_n)
        y_in = y
        y_spec = pl.BlockSpec((tile_n, c), lambda i: (i, 0))
        y_bytes = n * c * jnp.dtype(y.dtype).itemsize

    cost = pl.CostEstimate(
        flops=5 * n * c,
        transcendentals=n * c,
        bytes_accessed=n * c * itemsize + y_bytes + n_pad * 4,
    )

    row_losses = pl.pallas_call(
        kernel,
        out_shape=out_shape,
        grid_spec=pltpu.PrefetchScalarGridSpec(
            num_scalar_prefetch=0,
            grid=grid,
            in_specs=[x_spec, y_spec],
            out_specs=out_spec,
        ),
        compiler_params=pltpu.CompilerParams(
            # Row tiles are fully independent (no cross-step state).
            dimension_semantics=("parallel",),
            vmem_limit_bytes=vmem_limit,
        ),
        cost_estimate=cost,
    )(x, y_in)

    row = row_losses[0, :n] if lane_dense else row_losses[:n, 0]
    if reduction == "mean":
        return jnp.sum(row) / n      # matches -sum(X*y)/X.shape[0] (weight=None)
    elif reduction == "sum":
        return jnp.sum(row)
    return row                        # 'none': per-row loss, shape (N,)


if __name__ == "__main__":
    key = jax.random.PRNGKey(0)
    kx, ky, kx2, ky2 = jax.random.split(key, 4)

    # --- small case: dense (one-hot) targets + integer-label fast path -------
    N, C = 16, 32
    x = jax.random.normal(kx, (N, C), dtype=jnp.float32)
    labels = jax.random.randint(ky, (N,), 0, C)
    y = jax.nn.one_hot(labels, C, dtype=jnp.float32)

    logp = jax.nn.log_softmax(x, axis=1)
    ref_mean = -jnp.sum(logp * y) / N
    ref_sum = -jnp.sum(logp * y)
    ref_none = -jnp.sum(logp * y, axis=1)

    got_mean = cross_entropy_loss(x, y, reduction="mean")
    got_sum = cross_entropy_loss(x, y, reduction="sum")
    got_none = cross_entropy_loss(x, y, reduction="none")
    got_lbl = cross_entropy_loss(x, labels.astype(jnp.int32), reduction="none")
    jax.block_until_ready((got_mean, got_sum, got_none, got_lbl))

    assert jnp.allclose(got_mean, ref_mean, atol=1e-5, rtol=1e-5)
    assert jnp.allclose(got_sum, ref_sum, atol=1e-5, rtol=1e-5)
    assert jnp.allclose(got_none, ref_none, atol=1e-5, rtol=1e-5)
    assert jnp.allclose(got_lbl, ref_none, atol=1e-5, rtol=1e-5)

    # --- ragged batch exercising the lane-dense 128-row tile + masking -------
    N2, C2 = 200, 128
    x2 = jax.random.normal(kx2, (N2, C2), dtype=jnp.float32)
    l2 = jax.random.randint(ky2, (N2,), 0, C2)
    y2 = jax.nn.one_hot(l2, C2, dtype=jnp.float32)
    ref2 = -jnp.sum(jax.nn.log_softmax(x2, axis=1) * y2, axis=1)

    got2 = cross_entropy_loss(x2, y2, reduction="none")
    got2_lbl = cross_entropy_loss(x2, l2.astype(jnp.int32), reduction="none")
    jax.block_until_ready((got2, got2_lbl))
    assert jnp.allclose(got2, ref2, atol=1e-5, rtol=1e-5)
    assert jnp.allclose(got2_lbl, ref2, atol=1e-5, rtol=1e-5)

    print("KERNEL_OK")
</pallas_src>

<mosaic_0001>
module attributes {stable_mosaic.version = 11 : i64} {
  func.func @_ce_dense_kernel(%arg0: i32, %arg1: memref<16x32xf32, #tpu.memory_space<vmem>>, %arg2: memref<16x32xf32, #tpu.memory_space<vmem>>, %arg3: memref<16x1xf32, #tpu.memory_space<vmem>>) attributes {dimension_semantics = [#tpu.dimension_semantics<parallel>], iteration_bounds = array<i64: 1>, scalar_prefetch = 0 : i64, scratch_operands = 0 : i64, tpu.core_type = #tpu.core_type<tc>, window_params = [{transform_indices = @transform_0, window_bounds = array<i64: 16, 32>}, {transform_indices = @transform_1, window_bounds = array<i64: 16, 32>}, {transform_indices = @transform_2, window_bounds = array<i64: 16, 1>}]} {
    %c0 = arith.constant 0 : index
    %c0_0 = arith.constant 0 : index
    %0 = vector.load %arg1[%c0, %c0_0] : memref<16x32xf32, #tpu.memory_space<vmem>>, vector<16x32xf32>
    %c0_1 = arith.constant 0 : index
    %c0_2 = arith.constant 0 : index
    %1 = vector.load %arg2[%c0_1, %c0_2] : memref<16x32xf32, #tpu.memory_space<vmem>>, vector<16x32xf32>
    %cst = arith.constant dense<0xFF800000> : vector<16xf32>
    %2 = vector.multi_reduction <maximumf>, %0, %cst [1] : vector<16x32xf32> to vector<16xf32>
    %3 = vector.shape_cast %2 : vector<16xf32> to vector<16x1xf32>
    %4 = vector.broadcast %3 : vector<16x1xf32> to vector<16x32xf32>
    %5 = arith.subf %0, %4 : vector<16x32xf32>
    %6 = math.exp %5 : vector<16x32xf32>
    %cst_3 = arith.constant dense<0.000000e+00> : vector<16xf32>
    %7 = vector.multi_reduction <add>, %6, %cst_3 [1] : vector<16x32xf32> to vector<16xf32>
    %8 = math.log %7 : vector<16xf32>
    %9 = arith.addf %8, %2 : vector<16xf32>
    %cst_4 = arith.constant dense<0.000000e+00> : vector<16xf32>
    %10 = vector.multi_reduction <add>, %1, %cst_4 [1] : vector<16x32xf32> to vector<16xf32>
    %11 = arith.mulf %0, %1 : vector<16x32xf32>
    %cst_5 = arith.constant dense<0.000000e+00> : vector<16xf32>
    %12 = vector.multi_reduction <add>, %11, %cst_5 [1] : vector<16x32xf32> to vector<16xf32>
    %13 = arith.mulf %9, %10 : vector<16xf32>
    %14 = arith.subf %13, %12 : vector<16xf32>
    %c16_i32 = arith.constant 16 : i32
    %15 = arith.muli %arg0, %c16_i32 : i32
    %16 = tpu.iota {dimensions = array<i32: 0>} : vector<16x1xi32>
    %17 = vector.broadcast %15 : i32 to vector<16x1xi32>
    %18 = arith.addi %16, %17 : vector<16x1xi32>
    %19 = vector.shape_cast %14 : vector<16xf32> to vector<16x1xf32>
    %c16_i32_6 = arith.constant 16 : i32
    %20 = vector.broadcast %c16_i32_6 : i32 to vector<16x1xi32>
    %21 = arith.cmpi slt, %18, %20 : vector<16x1xi32>
    %cst_7 = arith.constant 0.000000e+00 : f32
    %22 = vector.broadcast %cst_7 : f32 to vector<16x1xf32>
    %23 = arith.select %21, %19, %22 : vector<16x1xi1>, vector<16x1xf32>
    %c0_8 = arith.constant 0 : index
    %c0_9 = arith.constant 0 : index
    %24 = vector.load %arg3[%c0_8, %c0_9] : memref<16x1xf32, #tpu.memory_space<vmem>>, vector<16x1xf32>
    tpu.vector_store %arg3[%c0_8, %c0_9], %23 {strides = array<i32>} : memref<16x1xf32, #tpu.memory_space<vmem>>, vector<16x1xf32>,
    return
  }
  func.func @transform_0(%arg0: i32) -> (i32, i32) {
    %c0_i32 = arith.constant 0 : i32
    %c0_i32_0 = arith.constant 0 : i32
    return %arg0, %c0_i32 : i32, i32
  }
  func.func @transform_1(%arg0: i32) -> (i32, i32) {
    %c0_i32 = arith.constant 0 : i32
    %c0_i32_0 = arith.constant 0 : i32
    return %arg0, %c0_i32 : i32, i32
  }
  func.func @transform_2(%arg0: i32) -> (i32, i32) {
    %c0_i32 = arith.constant 0 : i32
    %c0_i32_0 = arith.constant 0 : i32
    return %arg0, %c0_i32 : i32, i32
  }
}

</mosaic_0001>

<bundles_post_ra>
// kernel: tpu_custom_call.1
= control target key start
LH: loop header
LB: loop body
LE: loop exit
PB: predicated region body
PF: predicated region fallthrough
CT: control target
= control target key end

     0   :  { %7 = vsyncpa [#allocation3], 0  ;;  %s213_s0 = inlined_call_operand.hbm [shape: f32[16,32], index: 0, kind: input, shape index: {}]   ;;  %s214_s1 = inlined_call_operand.hbm [shape: f32[16,32], index: 1, kind: input, shape index: {}]   ;;  %s215_s2 = inlined_call_operand.vmem [shape: f32[16,1], index: 2, kind: output, shape index: {}]  }
   0x1   :  { %s13_s11 = sshll.u32 %s213_s0, 4  ;;  %s14_s11 = int_to_ptr.hbm [resolvable:$true] %s13_s11 }
   0x2   :  { %8 = vsyncpa [#allocation5], 0  ;;  %s174_s12 = smov [#allocation2]   ;;  %s26_s16 = sshll.u32 %s214_s1, 4  ;;  %s27_s16 = int_to_ptr.hbm [resolvable:$true] %s26_s16 }
   0x3   :  { %s15_s13 = sshll.u32 %s174_s12, 4  ;;  %s175_s17 = smov 128   ;;  %s16_s13 = int_to_ptr.vmem [resolvable:$true] %s15_s13 }
   0x4   :  { %s176_s18 = smov 8   ;;  %s177_s19 = smov [#allocation4]  }
   0x5   :  { %21 = dma.hbm_to_vmem [thread:$0]  %s14_s11, 256, %s16_s13, [#allocation3], %s175_s17, %s175_s17, %s176_s18  }
   0x6   :  { %s28_s20 = sshll.u32 %s177_s19, 4  ;;  %s29_s20 = int_to_ptr.vmem [resolvable:$true] %s28_s20 }
   0x7   :  { %34 = dma.hbm_to_vmem [thread:$0]  %s27_s16, 256, %s29_s20, [#allocation5], %s175_s17, %s175_s17, %s176_s18  }
   0x8   :  { %170 = dma.done.wait [#allocation3], 256  }
   0x9   :  { %171 = vsyncadd [#allocation3], 4294967040 }
   0xa   :  { %172 = dma.done.wait [#allocation5], 256  }
   0xb   :  { %173 = vsyncadd [#allocation5], 4294967040  ;;  %vm47_vm0 = vcmask 261120   ;;  %v43_v0 = vld [vmem:[#allocation2] sm:$0xff]  ;;  %v44_v2 = vld [vmem:[#allocation2 + $0x8] sm:$0xff]  ;;  %vm101_vm1 = vcmask 7168  }
   0xc   :  { %v48_v1 = vsel %vm47_vm0, %v43_v0, -inf  ;;  %v51_v3 = vsel %vm47_vm0, %v44_v2, -inf  ;;  %v45_v4 = vld [vmem:[#allocation4] sm:$0xff]  ;;  %v46_v8 = vld [vmem:[#allocation4 + $0x8] sm:$0xff] }
   0xd   :  { %49 = vmax.xlane.f32.xlu0 %v48_v1  ;;  %v72_v5 = vsel %vm47_vm0, %v45_v4, 0.0  ;;  %v78_v6 = vmul.f32 %v45_v4, %v43_v0  ;;  %v75_v9 = vsel %vm47_vm0, %v46_v8, 0.0  ;;  %v79_v20 = vmul.f32 %v46_v8, %v44_v2 }
   0xe   :  { %73 = vadd.xlane.f32.xlu2 %v72_v5 }
   0xf   :  { %v80_v7 = vsel %vm47_vm0, %v78_v6, 0.0  ;;  %v83_v21 = vsel %vm47_vm0, %v79_v20, 0.0 }
  0x15   :  { %52 = vmax.xlane.f32.xlu0 %v51_v3 }
  0x16   :  { %76 = vadd.xlane.f32.xlu2 %v75_v9 }
  0x1d   :  { %81 = vadd.xlane.f32.xlu0 %v80_v7 }
  0x80   :  { %v50_v10 = vpop.xlane.xlu0 %49 }
  0x81   :  { %v54_v11 = vsub.f32 %v43_v0, %v50_v10  ;;  %v74_v24 = vpop.xlane.xlu2 %73 }
  0x83   :  { %v56_v12 = vmul.f32 1.442695, %v54_v11 }
  0x85   :  { %114 = vpow2.f32 %v56_v12 }
  0x88   :  { %v53_v13 = vpop.xlane.xlu0 %52 }
  0x89   :  { %v55_v14 = vsub.f32 %v44_v2, %v53_v13  ;;  %v77_v33 = vpop.xlane.xlu2 %76 }
  0x8b   :  { %v115_v15 = vpop.eup %114  ;;  %v58_v16 = vmul.f32 1.442695, %v55_v14 }
  0x8c   :  { %v60_v17 = vsel %vm47_vm0, %v115_v15, 0.0 }
  0x8d   :  { %116 = vpow2.f32 %v58_v16  ;;  %61 = vadd.xlane.f32.xlu1 %v60_v17 }
  0x90   :  { %v82_v28 = vpop.xlane.xlu0 %81 }
  0x93   :  { %v117_v18 = vpop.eup %116 }
  0x94   :  { %v63_v19 = vsel %vm47_vm0, %v117_v18, 0.0 }
  0x95   :  { %64 = vadd.xlane.f32.xlu1 %v63_v19 }
  0x9d   :  { %84 = vadd.xlane.f32.xlu1 %v83_v21 }
 0x100   :  { %v62_v22 = vpop.xlane.xlu1 %61 }
 0x101   :  { %118 = vlog2.f32 %v62_v22 }
 0x107   :  { %v119_v23 = vpop.eup %118 }
 0x108   :  { %v67_v25 = vmul.f32 0.6931472, %v119_v23  ;;  %v65_v26 = vpop.xlane.xlu1 %64 }
 0x109   :  { %120 = vlog2.f32 %v65_v26 }
 0x10a   :  { %v70_v27 = vadd.f32 %v67_v25, %v50_v10 }
 0x10c   :  { %v86_v29 = vmul.f32 %v74_v24, %v70_v27 }
 0x10e   :  { %v88_v30 = vsub.f32 %v86_v29, %v82_v28 }
 0x10f   :  { %v121_v31 = vpop.eup %120 }
 0x110   :  { %v69_v32 = vmul.f32 0.6931472, %v121_v31  ;;  %102 = vst.msk [vmem:[%s215_s2] sm:$0xff] %vm101_vm1, %v88_v30  ;;  %v85_v35 = vpop.xlane.xlu1 %84 }
 0x112   :  { %v71_v34 = vadd.f32 %v69_v32, %v53_v13 }
 0x114   :  { %v87_v36 = vmul.f32 %v77_v33, %v71_v34 }
 0x116   :  { %v89_v37 = vsub.f32 %v87_v36, %v85_v35 }
 0x118   :  { %103 = vst.msk [vmem:[%s215_s2 + $0x8] sm:$0xff] %vm101_vm1, %v89_v37 }
 0x119   :  { %108 = vsyncpa [#allocation3], 1 }
 0x11a   :  { %109 = vsyncpa [#allocation5], 1 }

</bundles_post_ra>
